<compile_context>
chip_gen: v5e
topology: v5e:2x2
jax: 0.10.0
libtpu: 0.0.40
codegen_flags: <defaults>
</compile_context>

<pallas_src>
import functools

import numpy as np
import jax
import jax.numpy as jnp
from jax.experimental import pallas as pl
from jax.experimental.pallas import tpu as pltpu

SUBLANE = 8
MIN_SPLIT_BATCH = 256            # above this, use >= 2 batch blocks (v7x dual-TC)
MAX_BATCH_BLOCK = 1024           # amortize per-grid-step overhead (~0.35 us/step)
VMEM_ROW_BUDGET = 24 * 2**20     # conservative vs v5e 16 MiB scoped / v7x 64 MiB phys
COMPUTE_DTYPE = jnp.float32      # jnp.bfloat16 halves weight/activation HBM bytes on
                                 # v6e/v7x; re-check test tolerance before enabling.


def _rup(n, m):
    return ((n + m - 1) // m) * m


def _cdiv(a, b):
    return (a + b - 1) // b


# ------------------------------ fused kernel ------------------------------- #
def _ssae_fused_kernel(*refs, n_pre, pre_train, emit_inputs):
    """Straight-line fused SSAE forward.  All operands are full VMEM blocks
    except x / outputs which are tiled over the batch axis.

    Input refs:  x, (enc_w, enc_b) * n_pre, then
                   pre_train:  enc_w, enc_b, dec_w, dec_b, y_w, y_b
                   else:       enc_w, enc_b, y_w, y_b
    Output refs:   pre_train:  [inputs (only if n_pre>0)], reconstruction, y
                   else:       H, y
    Weights are pre-transposed to (in, out); biases are (1, out) rows.  All
    shapes are logical (no padding) -> no wrapper pad/slice copies.
    """
    n_in = 1 + 2 * n_pre + (6 if pre_train else 4)
    in_refs, out_refs = refs[:n_in], refs[n_in:]

    def linear(x, w, b, act):
        y = jnp.dot(x.astype(w.dtype), w, preferred_element_type=jnp.float32) + b
        return jnp.tanh(y) if act else y

    # Frozen pre-layers: chained tanh(linear) entirely in registers/VMEM.
    h = in_refs[0][...]
    for i in range(n_pre):
        h = linear(h, in_refs[1 + 2 * i][...], in_refs[2 + 2 * i][...], True)

    rest = [r[...] for r in in_refs[1 + 2 * n_pre:]]
    if pre_train:
        enc_w, enc_b, dec_w, dec_b, y_w, y_b = rest
        if emit_inputs:
            inp_ref, recon_ref, y_ref = out_refs
            inp_ref[...] = h.astype(inp_ref.dtype)
        else:  # layer_idx == 0: inputs == x, returned by the wrapper directly
            recon_ref, y_ref = out_refs
        H = linear(h, enc_w, enc_b, True)
        recon_ref[...] = linear(H, dec_w, dec_b, True).astype(recon_ref.dtype)
        y_ref[...] = linear(H, y_w, y_b, False).astype(y_ref.dtype)
    else:
        enc_w, enc_b, y_w, y_b = rest
        h_ref, y_ref = out_refs
        H = linear(h, enc_w, enc_b, True)
        h_ref[...] = H.astype(h_ref.dtype)
        y_ref[...] = linear(H, y_w, y_b, False).astype(y_ref.dtype)


# --------------------------- parameter creation ---------------------------- #
def _xavier_uniform(key, shape):
    fan_out, fan_in = shape
    a = float(np.sqrt(6.0 / (fan_in + fan_out)))
    return jax.random.uniform(key, shape, jnp.float32, -a, a)


def _xavier_normal(key, shape):
    fan_out, fan_in = shape
    std = float(np.sqrt(2.0 / (fan_in + fan_out)))
    return jax.random.normal(key, shape, jnp.float32) * std


def _bias_init(key, fan_in, out_dim):
    bound = float(1.0 / np.sqrt(fan_in))
    return jax.random.uniform(key, (out_dim,), jnp.float32, -bound, bound)


def init_ssae_params(ae_dims, key):
    """Mirror SSAE.__init__ (PyTorch layout: weight = (out_features, in_features))."""
    num_ae = len(ae_dims)
    params = []
    for i in range(1, num_ae + 1):
        if i != num_ae:
            in_dim, latent = ae_dims[i - 1], ae_dims[i]
        else:
            in_dim, latent = ae_dims[-1], ae_dims[-1]
        key, *ks = jax.random.split(key, 7)
        params.append(dict(
            enc_w=_xavier_uniform(ks[0], (latent, in_dim)),
            enc_b=_bias_init(ks[1], in_dim, latent),
            dec_w=_xavier_uniform(ks[2], (in_dim, latent)),
            dec_b=_bias_init(ks[3], latent, in_dim),
            y_w=_xavier_normal(ks[4], (1, latent)),
            y_b=_bias_init(ks[5], latent, 1),
        ))
    return params


def pack_ssae_params(params):
    """One-time transpose of PyTorch-layout weights to (in, out); biases to
    (1, out) rows.  Feature dims stay LOGICAL (no 128-lane padding) so the
    forward path never emits pad/slice copy kernels."""
    packed = []
    for p in params:
        packed.append(dict(
            enc_wt=jnp.asarray(p['enc_w'].T, COMPUTE_DTYPE),
            enc_b=jnp.asarray(p['enc_b'].reshape(1, -1), jnp.float32),
            dec_wt=jnp.asarray(p['dec_w'].T, COMPUTE_DTYPE),
            dec_b=jnp.asarray(p['dec_b'].reshape(1, -1), jnp.float32),
            y_wt=jnp.asarray(p['y_w'].T, COMPUTE_DTYPE),
            y_b=jnp.asarray(p['y_b'].reshape(1, -1), jnp.float32),
        ))
    return tuple(packed)


# ------------------------------ SSAE forward ------------------------------- #
@functools.partial(jax.jit, static_argnames=("layer_idx", "pre_train"))
def _ssae_forward_jit(packed_params, x, *, layer_idx, pre_train):
    num_ae = len(packed_params)
    B, D0 = x.shape

    n_pre = layer_idx if pre_train else num_ae - 1
    last = packed_params[layer_idx] if pre_train else packed_params[num_ae - 1]
    emit_inputs = bool(pre_train and n_pre > 0)

    in_dim, latent = last["enc_wt"].shape

    # Operand list (weights are grid-invariant full blocks).
    weights = []
    for i in range(n_pre):
        weights += [packed_params[i]["enc_wt"], packed_params[i]["enc_b"]]
    if pre_train:
        weights += [last["enc_wt"], last["enc_b"], last["dec_wt"], last["dec_b"],
                    last["y_wt"], last["y_b"]]
        out_widths = ([in_dim] if emit_inputs else []) + [in_dim, 1]
    else:
        weights += [last["enc_wt"], last["enc_b"], last["y_wt"], last["y_b"]]
        out_widths = [latent, 1]
    w_bytes = sum(int(np.prod(a.shape)) * a.dtype.itemsize for a in weights)

    # ---- batch tile selection ------------------------------------------ #
    # double-buffered f32 bytes per batch row (x tile + all output tiles)
    row_bytes = 2 * 4 * (D0 + sum(out_widths))
    vmem_cap_rows = max(
        SUBLANE,
        ((VMEM_ROW_BUDGET - 2 * w_bytes) // max(row_bytes, 1)) // SUBLANE * SUBLANE)
    if B <= MIN_SPLIT_BATCH:
        bt = B                              # single block (block == full array dims)
    else:
        # >= 2 blocks so v7x's two TensorCores both get work; cap by VMEM budget.
        bt = int(min(MAX_BATCH_BLOCK, vmem_cap_rows, _rup(_cdiv(B, 2), SUBLANE)))
    grid = (_cdiv(B, bt),)                  # partial last block handled by Pallas

    def full_spec(arr):
        return pl.BlockSpec(arr.shape, lambda i: (0, 0))

    def batch_spec(cols):
        return pl.BlockSpec((bt, cols), lambda i: (i, 0))

    in_specs = [batch_spec(D0)] + [full_spec(a) for a in weights]
    out_shape = tuple(jax.ShapeDtypeStruct((B, w), jnp.float32) for w in out_widths)
    out_specs = [batch_spec(w) for w in out_widths]

    est_bytes = row_bytes * bt + 2 * w_bytes
    cp_kwargs = {"dimension_semantics": ("parallel",)}
    if est_bytes > 12 * 2**20:              # v5e default scoped VMEM is 16 MiB
        cp_kwargs["vmem_limit_bytes"] = int(
            min(64 * 2**20, max(32 * 2**20, est_bytes + (4 << 20))))

    outs = pl.pallas_call(
        functools.partial(_ssae_fused_kernel, n_pre=n_pre, pre_train=pre_train,
                          emit_inputs=emit_inputs),
        out_shape=out_shape,
        grid=grid,
        in_specs=in_specs,
        out_specs=out_specs,
        compiler_params=pltpu.CompilerParams(**cp_kwargs),
    )(x, *weights)

    if pre_train:
        if emit_inputs:
            return outs[0], outs[1], outs[2]
        return x, outs[0], outs[1]          # layer_idx == 0: inputs are x itself
    return outs[0], outs[1]


def ssae_forward(packed_params, x, layer_idx, preTrain=False):
    """SSAE.forward semantics (inference math)."""
    # TODO(synk): requires_grad bookkeeping has no inference-time equivalent.
    return _ssae_forward_jit(tuple(packed_params), x,
                             layer_idx=int(layer_idx), pre_train=bool(preTrain))


# ----------------------------- pure-JAX check ------------------------------ #
def _ref_linear(x, w, b, apply_tanh):
    y = x @ w.T + b
    return jnp.tanh(y) if apply_tanh else y


def ssae_forward_ref(params, x, layer_idx, preTrain=False):
    output = x
    if preTrain:
        for i in range(layer_idx):
            output = _ref_linear(output, params[i]['enc_w'], params[i]['enc_b'], True)
        inputs = output
        p = params[layer_idx]
        H = _ref_linear(output, p['enc_w'], p['enc_b'], True)
        return inputs, _ref_linear(H, p['dec_w'], p['dec_b'], True), \
            _ref_linear(H, p['y_w'], p['y_b'], False)
    for i in range(len(params) - 1):
        output = _ref_linear(output, params[i]['enc_w'], params[i]['enc_b'], True)
    p = params[-1]
    H = _ref_linear(output, p['enc_w'], p['enc_b'], True)
    return H, _ref_linear(H, p['y_w'], p['y_b'], False)


# ----------------------------------- main ---------------------------------- #
if __name__ == "__main__":
    key = jax.random.PRNGKey(0)
    k_param, k_x, k_xb = jax.random.split(key, 3)

    ae_dims = [64, 32, 16]            # -> AEs: 64->32, 32->16, 16->16
    batch = 8
    params = init_ssae_params(ae_dims, k_param)          # PyTorch layout (ref)
    packed = pack_ssae_params(params)                    # one-time pack for TPU
    x = jax.random.normal(k_x, (batch, ae_dims[0]), jnp.float32)

    def check(a, b, rtol=1e-5, atol=1e-5):
        np.testing.assert_allclose(np.asarray(a), np.asarray(b), rtol=rtol, atol=atol)

    # default path (preTrain=False): (H_last, y_estimate)
    H, y_est = ssae_forward(packed, x, layer_idx=0, preTrain=False)
    jax.block_until_ready((H, y_est))
    H_ref, y_ref = ssae_forward_ref(params, x, layer_idx=0, preTrain=False)
    assert H.shape == (batch, ae_dims[-1]) and y_est.shape == (batch, 1)
    check(H, H_ref); check(y_est, y_ref)

    # preTrain path for layer 0: inputs are x itself (no extra HBM write)
    inputs0, recon0, y0 = ssae_forward(packed, x, layer_idx=0, preTrain=True)
    jax.block_until_ready((inputs0, recon0, y0))
    inputs0_r, recon0_r, y0_r = ssae_forward_ref(params, x, layer_idx=0, preTrain=True)
    assert inputs0.shape == (batch, ae_dims[0]) and recon0.shape == (batch, ae_dims[0])
    check(inputs0, inputs0_r); check(recon0, recon0_r); check(y0, y0_r)

    # preTrain path for a middle layer: (inputs, reconstruction, y_estimate)
    inputs, recon, y2 = ssae_forward(packed, x, layer_idx=1, preTrain=True)
    jax.block_until_ready((inputs, recon, y2))
    inputs_r, recon_r, y2_r = ssae_forward_ref(params, x, layer_idx=1, preTrain=True)
    assert inputs.shape == (batch, ae_dims[1])
    assert recon.shape == (batch, ae_dims[1]) and y2.shape == (batch, 1)
    check(inputs, inputs_r); check(recon, recon_r); check(y2, y2_r)

    # preTrain path for the last AE (dims[-1] -> dims[-1])
    inputs3, recon3, y3 = ssae_forward(packed, x, layer_idx=len(params) - 1,
                                       preTrain=True)
    jax.block_until_ready((inputs3, recon3, y3))
    inputs3_r, recon3_r, y3_r = ssae_forward_ref(params, x,
                                                 layer_idx=len(params) - 1,
                                                 preTrain=True)
    check(inputs3, inputs3_r); check(recon3, recon3_r); check(y3, y3_r)

    # bigger batch: exercises the >=2-block parallel grid and a partial last block
    big = 600
    xb = jax.random.normal(k_xb, (big, ae_dims[0]), jnp.float32)
    Hb, yb = ssae_forward(packed, xb, layer_idx=0, preTrain=False)
    jax.block_until_ready((Hb, yb))
    Hb_ref, yb_ref = ssae_forward_ref(params, xb, layer_idx=0, preTrain=False)
    assert Hb.shape == (big, ae_dims[-1]) and yb.shape == (big, 1)
    check(Hb, Hb_ref); check(yb, yb_ref)

    print("KERNEL_OK")
</pallas_src>

<mosaic_0001>
module attributes {stable_mosaic.version = 11 : i64} {
  func.func @_ssae_fused_kernel(%arg0: i32, %arg1: memref<8x64xf32, #tpu.memory_space<vmem>>, %arg2: memref<64x32xf32, #tpu.memory_space<vmem>>, %arg3: memref<1x32xf32, #tpu.memory_space<vmem>>, %arg4: memref<32x16xf32, #tpu.memory_space<vmem>>, %arg5: memref<1x16xf32, #tpu.memory_space<vmem>>, %arg6: memref<16x16xf32, #tpu.memory_space<vmem>>, %arg7: memref<1x16xf32, #tpu.memory_space<vmem>>, %arg8: memref<16x1xf32, #tpu.memory_space<vmem>>, %arg9: memref<1x1xf32, #tpu.memory_space<vmem>>, %arg10: memref<8x16xf32, #tpu.memory_space<vmem>>, %arg11: memref<8x1xf32, #tpu.memory_space<vmem>>) attributes {dimension_semantics = [#tpu.dimension_semantics<parallel>], iteration_bounds = array<i64: 1>, scalar_prefetch = 0 : i64, scratch_operands = 0 : i64, tpu.core_type = #tpu.core_type<tc>, window_params = [{transform_indices = @transform_0, window_bounds = array<i64: 8, 64>}, {pipeline_mode = #tpu.pipeline_mode<synchronous>, transform_indices = @transform_1, window_bounds = array<i64: 64, 32>}, {pipeline_mode = #tpu.pipeline_mode<synchronous>, transform_indices = @transform_2, window_bounds = array<i64: 1, 32>}, {pipeline_mode = #tpu.pipeline_mode<synchronous>, transform_indices = @transform_3, window_bounds = array<i64: 32, 16>}, {pipeline_mode = #tpu.pipeline_mode<synchronous>, transform_indices = @transform_4, window_bounds = array<i64: 1, 16>}, {pipeline_mode = #tpu.pipeline_mode<synchronous>, transform_indices = @transform_5, window_bounds = array<i64: 16, 16>}, {pipeline_mode = #tpu.pipeline_mode<synchronous>, transform_indices = @transform_6, window_bounds = array<i64: 1, 16>}, {pipeline_mode = #tpu.pipeline_mode<synchronous>, transform_indices = @transform_7, window_bounds = array<i64: 16, 1>}, {pipeline_mode = #tpu.pipeline_mode<synchronous>, transform_indices = @transform_8, window_bounds = array<i64: 1, 1>}, {transform_indices = @transform_9, window_bounds = array<i64: 8, 16>}, {transform_indices = @transform_10, window_bounds = array<i64: 8, 1>}]} {
    %c0 = arith.constant 0 : index
    %c0_0 = arith.constant 0 : index
    %0 = vector.load %arg1[%c0, %c0_0] : memref<8x64xf32, #tpu.memory_space<vmem>>, vector<8x64xf32>
    %c0_1 = arith.constant 0 : index
    %c0_2 = arith.constant 0 : index
    %1 = vector.load %arg2[%c0_1, %c0_2] : memref<64x32xf32, #tpu.memory_space<vmem>>, vector<64x32xf32>
    %c0_3 = arith.constant 0 : index
    %c0_4 = arith.constant 0 : index
    %2 = vector.load %arg3[%c0_3, %c0_4] : memref<1x32xf32, #tpu.memory_space<vmem>>, vector<1x32xf32>
    %cst = arith.constant dense<0.000000e+00> : vector<8x32xf32>
    %3 = tpu.matmul %0, %1, %cst {dimension_numbers = #tpu.dot_dimension_numbers<[1], [0], [0], [1], [0, 0, 1, 1], [], []>} : vector<8x64xf32>, vector<64x32xf32>, vector<8x32xf32> -> vector<8x32xf32>
    %4 = vector.broadcast %2 : vector<1x32xf32> to vector<8x32xf32>
    %5 = arith.addf %3, %4 : vector<8x32xf32>
    %6 = math.tanh %5 : vector<8x32xf32>
    %c0_5 = arith.constant 0 : index
    %c0_6 = arith.constant 0 : index
    %7 = vector.load %arg4[%c0_5, %c0_6] : memref<32x16xf32, #tpu.memory_space<vmem>>, vector<32x16xf32>
    %c0_7 = arith.constant 0 : index
    %c0_8 = arith.constant 0 : index
    %8 = vector.load %arg5[%c0_7, %c0_8] : memref<1x16xf32, #tpu.memory_space<vmem>>, vector<1x16xf32>
    %cst_9 = arith.constant dense<0.000000e+00> : vector<8x16xf32>
    %9 = tpu.matmul %6, %7, %cst_9 {dimension_numbers = #tpu.dot_dimension_numbers<[1], [0], [0], [1], [0, 0, 1, 1], [], []>} : vector<8x32xf32>, vector<32x16xf32>, vector<8x16xf32> -> vector<8x16xf32>
    %10 = vector.broadcast %8 : vector<1x16xf32> to vector<8x16xf32>
    %11 = arith.addf %9, %10 : vector<8x16xf32>
    %12 = math.tanh %11 : vector<8x16xf32>
    %c0_10 = arith.constant 0 : index
    %c0_11 = arith.constant 0 : index
    %13 = vector.load %arg6[%c0_10, %c0_11] : memref<16x16xf32, #tpu.memory_space<vmem>>, vector<16x16xf32>
    %c0_12 = arith.constant 0 : index
    %c0_13 = arith.constant 0 : index
    %14 = vector.load %arg7[%c0_12, %c0_13] : memref<1x16xf32, #tpu.memory_space<vmem>>, vector<1x16xf32>
    %c0_14 = arith.constant 0 : index
    %c0_15 = arith.constant 0 : index
    %15 = vector.load %arg8[%c0_14, %c0_15] : memref<16x1xf32, #tpu.memory_space<vmem>>, vector<16x1xf32>
    %c0_16 = arith.constant 0 : index
    %c0_17 = arith.constant 0 : index
    %16 = vector.load %arg9[%c0_16, %c0_17] : memref<1x1xf32, #tpu.memory_space<vmem>>, vector<1x1xf32>
    %cst_18 = arith.constant dense<0.000000e+00> : vector<8x16xf32>
    %17 = tpu.matmul %12, %13, %cst_18 {dimension_numbers = #tpu.dot_dimension_numbers<[1], [0], [0], [1], [0, 0, 1, 1], [], []>} : vector<8x16xf32>, vector<16x16xf32>, vector<8x16xf32> -> vector<8x16xf32>
    %18 = vector.broadcast %14 : vector<1x16xf32> to vector<8x16xf32>
    %19 = arith.addf %17, %18 : vector<8x16xf32>
    %20 = math.tanh %19 : vector<8x16xf32>
    %c0_19 = arith.constant 0 : index
    %c0_20 = arith.constant 0 : index
    %21 = vector.load %arg10[%c0_19, %c0_20] : memref<8x16xf32, #tpu.memory_space<vmem>>, vector<8x16xf32>
    tpu.vector_store %arg10[%c0_19, %c0_20], %20 {strides = array<i32>} : memref<8x16xf32, #tpu.memory_space<vmem>>, vector<8x16xf32>,
    %cst_21 = arith.constant dense<0.000000e+00> : vector<8x1xf32>
    %22 = tpu.matmul %20, %15, %cst_21 {dimension_numbers = #tpu.dot_dimension_numbers<[1], [0], [0], [1], [0, 0, 1, 1], [], []>} : vector<8x16xf32>, vector<16x1xf32>, vector<8x1xf32> -> vector<8x1xf32>
    %23 = vector.broadcast %16 : vector<1x1xf32> to vector<8x1xf32>
    %24 = arith.addf %22, %23 : vector<8x1xf32>
    %c0_22 = arith.constant 0 : index
    %c0_23 = arith.constant 0 : index
    %25 = vector.load %arg11[%c0_22, %c0_23] : memref<8x1xf32, #tpu.memory_space<vmem>>, vector<8x1xf32>
    tpu.vector_store %arg11[%c0_22, %c0_23], %24 {strides = array<i32>} : memref<8x1xf32, #tpu.memory_space<vmem>>, vector<8x1xf32>,
    return
  }
  func.func @transform_0(%arg0: i32) -> (i32, i32) {
    %c0_i32 = arith.constant 0 : i32
    %c0_i32_0 = arith.constant 0 : i32
    return %arg0, %c0_i32 : i32, i32
  }
  func.func @transform_1(%arg0: i32) -> (i32, i32) {
    %c0_i32 = arith.constant 0 : i32
    %c0_i32_0 = arith.constant 0 : i32
    %c0_i32_1 = arith.constant 0 : i32
    return %c0_i32, %c0_i32_0 : i32, i32
  }
  func.func @transform_2(%arg0: i32) -> (i32, i32) {
    %c0_i32 = arith.constant 0 : i32
    %c0_i32_0 = arith.constant 0 : i32
    %c0_i32_1 = arith.constant 0 : i32
    return %c0_i32, %c0_i32_0 : i32, i32
  }
  func.func @transform_3(%arg0: i32) -> (i32, i32) {
    %c0_i32 = arith.constant 0 : i32
    %c0_i32_0 = arith.constant 0 : i32
    %c0_i32_1 = arith.constant 0 : i32
    return %c0_i32, %c0_i32_0 : i32, i32
  }
  func.func @transform_4(%arg0: i32) -> (i32, i32) {
    %c0_i32 = arith.constant 0 : i32
    %c0_i32_0 = arith.constant 0 : i32
    %c0_i32_1 = arith.constant 0 : i32
    return %c0_i32, %c0_i32_0 : i32, i32
  }
  func.func @transform_5(%arg0: i32) -> (i32, i32) {
    %c0_i32 = arith.constant 0 : i32
    %c0_i32_0 = arith.constant 0 : i32
    %c0_i32_1 = arith.constant 0 : i32
    return %c0_i32, %c0_i32_0 : i32, i32
  }
  func.func @transform_6(%arg0: i32) -> (i32, i32) {
    %c0_i32 = arith.constant 0 : i32
    %c0_i32_0 = arith.constant 0 : i32
    %c0_i32_1 = arith.constant 0 : i32
    return %c0_i32, %c0_i32_0 : i32, i32
  }
  func.func @transform_7(%arg0: i32) -> (i32, i32) {
    %c0_i32 = arith.constant 0 : i32
    %c0_i32_0 = arith.constant 0 : i32
    %c0_i32_1 = arith.constant 0 : i32
    return %c0_i32, %c0_i32_0 : i32, i32
  }
  func.func @transform_8(%arg0: i32) -> (i32, i32) {
    %c0_i32 = arith.constant 0 : i32
    %c0_i32_0 = arith.constant 0 : i32
    %c0_i32_1 = arith.constant 0 : i32
    return %c0_i32, %c0_i32_0 : i32, i32
  }
  func.func @transform_9(%arg0: i32) -> (i32, i32) {
    %c0_i32 = arith.constant 0 : i32
    %c0_i32_0 = arith.constant 0 : i32
    return %arg0, %c0_i32 : i32, i32
  }
  func.func @transform_10(%arg0: i32) -> (i32, i32) {
    %c0_i32 = arith.constant 0 : i32
    %c0_i32_0 = arith.constant 0 : i32
    return %arg0, %c0_i32 : i32, i32
  }
}

</mosaic_0001>

<bundles_post_ra>
// kernel: _ssae_forward_jit.1
= control target key start
LH: loop header
LB: loop body
LE: loop exit
PB: predicated region body
PF: predicated region fallthrough
CT: control target
= control target key end

     0   :  { %s357_s0 = inlined_call_operand.vmem [shape: f32[8,64], index: 0, kind: input, shape index: {}]   ;;  %s358_s1 = inlined_call_operand.vmem [shape: f32[64,32], index: 1, kind: input, shape index: {}]   ;;  %s359_s2 = inlined_call_operand.vmem [shape: f32[1,32], index: 2, kind: input, shape index: {}]   ;;  %s360_s3 = inlined_call_operand.vmem [shape: f32[32,16], index: 3, kind: input, shape index: {}]   ;;  %s361_s4 = inlined_call_operand.vmem [shape: f32[1,16], index: 4, kind: input, shape index: {}]   ;;  %s362_s5 = inlined_call_operand.vmem [shape: f32[16,16], index: 5, kind: input, shape index: {}]   ;;  %s363_s6 = inlined_call_operand.vmem [shape: f32[1,16], index: 6, kind: input, shape index: {}]   ;;  %s364_s7 = inlined_call_operand.vmem [shape: f32[16,1], index: 7, kind: input, shape index: {}]   ;;  %s365_s8 = inlined_call_operand.<no memory space> [shape: f32[1,1], index: 8, kind: input, shape index: {}]   ;;  %s366_s9 = inlined_call_operand.hbm [shape: f32[8,16], index: 9, kind: output, shape index: {0}]   ;;  %s367_s10 = inlined_call_operand.vmem [shape: f32[8,1], index: 10, kind: output, shape index: {1}]  }
   0x1   :  { %v16_v0 = vstv %s365_s8 }
   0x2   :  { %17 = vst [vmem:[#allocation2] sm:$0x1] %v16_v0 }
   0x3   :  { %v45_v1 = vld [vmem:[%s358_s1 + $0x38] sm:$0xff]  ;;  %v44_v2 = vld [vmem:[%s358_s1 + $0x30] sm:$0xff]  ;;  %v43_v3 = vld [vmem:[%s358_s1 + $0x28] sm:$0xff] }
   0x4   :  { %62 = vmatpush.msra.mxu0 %v45_v1  ;;  %v42_v4 = vld [vmem:[%s358_s1 + $0x20] sm:$0xff] }
   0x6   :  { %63 = vmatpush.msra.mxu0 %v44_v2 }
   0x7   :  { %18 = vsyncpa [#allocation4], 0  ;;  %v41_v5 = vld [vmem:[%s358_s1 + $0x18] sm:$0xff]  ;;  %v40_v6 = vld [vmem:[%s358_s1 + $0x10] sm:$0xff]  ;;  %vm50_vm0 = vcmask 523264   ;;  %vm83_vm1 = vcmask 261120  }
   0x8   :  { %64 = vmatpush.msra.mxu0 %v43_v3  ;;  %v39_v7 = vld [vmem:[%s358_s1 + $0x8] sm:$0xff]  ;;  %v38_v8 = vld [vmem:[%s358_s1] sm:$0xff]  ;;  %v78_v10 = vld [vmem:[%s360_s3 + $0x18] sm:$0xff]  ;;  %vm117_vm2 = vcmask 130048   ;;  %s178_s11 = sshll.u32 %s366_s9, 4  ;;  %vm169_vm3 = vcmask 7168   ;;  %s179_s11 = int_to_ptr.hbm [resolvable:$true] %s178_s11 }
   0x9   :  { %v37_v9 = vld [vmem:[%s357_s0] sm:$0xff]  ;;  %99 = vmatpush.msra.mxu1 %v78_v10  ;;  %v77_v11 = vld [vmem:[%s360_s3 + $0x10] sm:$0xff]  ;;  %v76_v12 = vld [vmem:[%s360_s3 + $0x8] sm:$0xff] }
   0xa   :  { %65 = vmatpush.msra.mxu0 %v42_v4  ;;  %v75_v13 = vld [vmem:[%s360_s3] sm:$0xff]  ;;  %v109_v18 = vld [vmem:[%s362_s5 + $0x8] sm:$0xff] }
   0xb   :  { %100 = vmatpush.msra.mxu1 %v77_v11  ;;  %v196_v14 = vld [vmem:[%s359_s2] ss:$0 sm:$0xff]  ;;  %135 = vmatpush.msra.mxu2 %v109_v18  ;;  %v112_v24 = vld [vmem:[%s364_s7 + $0x8] sm:$0xff] }
   0xc   :  { %66 = vmatpush.msra.mxu0 %v41_v5  ;;  %v108_v19 = vld [vmem:[%s362_s5] sm:$0xff]  ;;  %163 = vmatpush.msra.mxu3 %v112_v24 }
   0xd   :  { %101 = vmatpush.msra.mxu1 %v76_v12  ;;  %136 = vmatpush.msra.mxu2 %v108_v19  ;;  %v197_v20 = vld [vmem:[%s361_s4] ss:$0 sm:$0xff]  ;;  %s232_s4 = smov [#allocation3]  }
   0xe   :  { %67 = vmatpush.msra.mxu0 %v40_v6  ;;  %v111_v25 = vld [vmem:[%s364_s7] sm:$0xff]  ;;  %s176_s28 = sshll.u32 %s232_s4, 4  ;;  %s177_s28 = int_to_ptr.vmem [resolvable:$true] %s176_s28 }
   0xf   :  { %102 = vmatpush.msra.mxu1 %v75_v13  ;;  %164 = vmatpush.msra.mxu3 %v111_v25  ;;  %v198_v26 = vld [vmem:[%s363_s6] ss:$0 sm:$0xff] }
  0x10   :  { %68 = vmatpush.msra.mxu0 %v39_v7  ;;  %v199_v30 = vld [vmem:[#allocation2] ss:$0 sm:$0xff] }
  0x12   :  { %69 = vmatpush.msra.mxu0 %v38_v8 }
  0x13   :  { %191 = vmatmul.msk.f32.vlgmr.msra.gmra.mxu0 %vm50_vm0, %v37_v9 }
  0x90   :  { %v71_v15 = vpop.f32.mrf.mxu0 }
  0x91   :  { %v72_v16 = vadd.f32 %v196_v14, %v71_v15 }
  0x93   :  { %200 = vtanh.f32 %v72_v16 }
  0x99   :  { %v201_v17 = vpop.eup %200 }
  0x9a   :  { %192 = vmatmul.msk.f32.vlgmr.msra.gmra.mxu1 %vm83_vm1, %v201_v17 }
 0x117   :  { %v104_v21 = vpop.f32.mrf.mxu1 }
 0x118   :  { %v105_v22 = vadd.f32 %v197_v20, %v104_v21 }
 0x11a   :  { %202 = vtanh.f32 %v105_v22 }
 0x120   :  { %v203_v23 = vpop.eup %202 }
 0x121   :  { %193 = vmatmul.msk.f32.vlgmr.msra.gmra.mxu2 %vm117_vm2, %v203_v23 }
 0x1a4   :  { %v138_v27 = vpop.f32.mrf.mxu2 }
 0x1a5   :  { %v139_v28 = vadd.f32 %v198_v26, %v138_v27 }
 0x1a7   :  { %204 = vtanh.f32 %v139_v28 }
 0x1ad   :  { %v205_v29 = vpop.eup %204 }
 0x1ae   :  { %142 = vst.msk [vmem:[#allocation3] sm:$0xff] %vm117_vm2, %v205_v29  ;;  %194 = vmatmul.msk.f32.vlgmr.msra.gmra.mxu3 %vm117_vm2, %v205_v29 }
 0x1af   :  { %181 = dma.vmem_to_hbm [thread:$0]  %s177_s28, 128, %s179_s11, [#allocation4]  }
 0x231   :  { %v166_v31 = vpop.f32.mrf.mxu3 }
 0x232   :  { %v167_v32 = vadd.f32 %v199_v30, %v166_v31 }
 0x234   :  { %170 = vst.msk [vmem:[%s367_s10] sm:$0xff] %vm169_vm3, %v167_v32 }
 0x235   :  { %230 = dma.done.wait [#allocation4], 128  }
 0x236   :  { %231 = vsyncadd [#allocation4], 4294967168 }
 0x237   :  { %190 = vsyncpa [#allocation4], 1 }

</bundles_post_ra>
